<compile_context>
chip_gen: v5e
topology: v5e:2x2
jax: 0.10.0
libtpu: 0.0.40
codegen_flags: <defaults>
</compile_context>

<pallas_src>
from functools import partial

import numpy as np
import jax
import jax.numpy as jnp
from jax.experimental import pallas as pl
from jax.experimental.pallas import tpu as pltpu

LANE = 128  # TPU lane width


# ----------------------------------------------------------------------------
# Deterministic parameter construction (mirrors torchaudio defaults)
# ----------------------------------------------------------------------------
def hann_window_periodic(win_length: int) -> np.ndarray:
    n = np.arange(win_length, dtype=np.float64)
    return (0.5 * (1.0 - np.cos(2.0 * np.pi * n / win_length))).astype(np.float32)


def melscale_fbanks_htk(n_freqs: int, f_min: float, f_max: float,
                        n_mels: int, sample_rate: int) -> np.ndarray:
    """torchaudio.functional.melscale_fbanks with mel_scale='htk', norm=None."""
    def hz_to_mel(f):
        return 2595.0 * np.log10(1.0 + f / 700.0)

    def mel_to_hz(m):
        return 700.0 * (10.0 ** (m / 2595.0) - 1.0)

    all_freqs = np.linspace(0.0, sample_rate // 2, n_freqs)
    m_pts = np.linspace(hz_to_mel(f_min), hz_to_mel(f_max), n_mels + 2)
    f_pts = mel_to_hz(m_pts)

    f_diff = f_pts[1:] - f_pts[:-1]                       # (n_mels+1,)
    slopes = f_pts[None, :] - all_freqs[:, None]          # (n_freqs, n_mels+2)
    down_slopes = (-1.0 * slopes[:, :-2]) / f_diff[:-1]   # (n_freqs, n_mels)
    up_slopes = slopes[:, 2:] / f_diff[1:]                # (n_freqs, n_mels)
    fb = np.maximum(0.0, np.minimum(down_slopes, up_slopes))
    return fb.astype(np.float32)


def fused_dft_basis(n_fft: int, window: np.ndarray) -> np.ndarray:
    """Windowed real-DFT basis [w*cos | -w*sin], shape (n_fft, 2*(n_fft//2+1))."""
    n_freq = n_fft // 2 + 1
    n = np.arange(n_fft, dtype=np.float64)[:, None]
    k = np.arange(n_freq, dtype=np.float64)[None, :]
    ang = 2.0 * np.pi * n * k / n_fft
    w = window[:, None].astype(np.float64)
    return np.concatenate([w * np.cos(ang), w * (-np.sin(ang))], axis=1).astype(np.float32)


# ----------------------------------------------------------------------------
# Pallas kernel: VMEM framing + fused STFT power + mel + log10 + inf mask + transpose
# ----------------------------------------------------------------------------
def _melspec_kernel(xw_ref, basis_ref, melfb_ref, out_ref, frames_ref):
    """Single grid step; all batch rows folded into the matmul M dimension.

    xw_ref:     (B, n_chunks, hop)  reflect-padded waveform as hop-sized chunks
    basis_ref:  (n_fft, K2=128)     windowed [cos | -sin] DFT basis, zero lane-padded
    melfb_ref:  (K2, 128)           [melfb ; melfb ; 0], columns zero-padded
    out_ref:    (B, n_mels, F)      log-mel, already transposed; last STFT frame dropped
    frames_ref: (B*F, n_fft)        VMEM scratch holding the frame matrix
    """
    B = xw_ref.shape[0]
    hop = xw_ref.shape[2]
    n_fft = basis_ref.shape[0]
    ratio = n_fft // hop
    n_mels = out_ref.shape[1]
    F = out_ref.shape[2]

    # Assemble the frame matrix: frame f of batch b is chunks f..f+ratio-1 of that
    # batch laid out contiguously along lanes.  Static slices/stores, no gather.
    for b in range(B):
        for s in range(ratio):
            frames_ref[b * F:(b + 1) * F, s * hop:(s + 1) * hop] = xw_ref[b, s:s + F, :]
    frames = frames_ref[...]                                        # (B*F, n_fft)

    # One K=n_fft MXU matmul for the whole batch -> [re | im | 0...] (lane-dense 128).
    y = jnp.dot(frames, basis_ref[...],
                preferred_element_type=jnp.float32,
                precision=jax.lax.Precision.HIGHEST)                # (B*F, K2)
    sq = y * y                                                      # re^2 | im^2 | 0
    mel = jnp.dot(sq, melfb_ref[...],                               # == power @ melfb
                  preferred_element_type=jnp.float32,
                  precision=jax.lax.Precision.HIGHEST)              # (B*F, 128)
    logmel = jnp.log10(mel)                                         # log10(0) -> -inf
    logmel = jnp.where(jnp.isinf(logmel), 0.0, logmel)              # inf mask -> 0

    # In-kernel transpose (rides the otherwise-idle XLU); the (B*F, 128) operand is
    # fully (8,128)-tile aligned.  Padded mel columns are dropped by the [:n_mels] cut.
    logmel_t = logmel.T                                             # (128, B*F)
    for b in range(B):
        out_ref[b] = logmel_t[:n_mels, b * F:(b + 1) * F]           # (n_mels, F)


@partial(jax.jit, static_argnames=("sample_rate", "n_fft", "hop_length",
                                   "n_mels", "f_min", "f_max"))
def mel_spectrogram_fixed(x, *, sample_rate=16000, n_fft=64, hop_length=16,
                          n_mels=16, f_min=0.0, f_max=None):
    """x: (batch, time) float32 waveform. Returns (batch, n_mels, time // hop_length)."""
    if f_max is None:
        f_max = float(sample_rate) / 2.0
    n_freq = n_fft // 2 + 1
    B, T = x.shape
    assert n_fft % hop_length == 0, "in-kernel framing requires hop | n_fft"
    assert T % hop_length == 0, "in-kernel framing requires hop | time"

    # Trace-time constants, zero-padded to lane width (changes no results).
    window = hann_window_periodic(n_fft)
    basis = fused_dft_basis(n_fft, window)                          # (n_fft, 2*n_freq)
    melfb = melscale_fbanks_htk(n_freq, f_min, f_max, n_mels, sample_rate)
    k2 = ((2 * n_freq + LANE - 1) // LANE) * LANE                   # 66 -> 128
    m_pad = ((n_mels + LANE - 1) // LANE) * LANE                    # 16 -> 128
    basis_pad = np.zeros((n_fft, k2), np.float32)
    basis_pad[:, :2 * n_freq] = basis
    melfb_pad = np.zeros((k2, m_pad), np.float32)
    melfb_pad[:n_freq, :n_mels] = melfb
    melfb_pad[n_freq:2 * n_freq, :n_mels] = melfb

    # XLA glue inside the same jit: center reflect-pad (torch.stft center=True) + the
    # free hop-chunk reshape.  No frame gather, no 4x HBM materialization.
    # TODO(synk): reflect padding could also be built fully in-kernel from reversed
    # static slices; kept as jitted XLA glue since it is a single fused program here.
    pad = n_fft // 2
    xp = jnp.pad(x.astype(jnp.float32), ((0, 0), (pad, pad)), mode="reflect")
    n_chunks = (T + n_fft) // hop_length
    xw = xp.reshape(B, n_chunks, hop_length)

    # torch.stft(center=True) yields 1 + T//hop frames; the module drops the last one,
    # so only F = T//hop frames are ever computed or written.
    F = T // hop_length

    return pl.pallas_call(
        _melspec_kernel,
        out_shape=jax.ShapeDtypeStruct((B, n_mels, F), jnp.float32),
        grid=(1,),   # single step: batch folded into the matmul M dimension
        in_specs=[
            pl.BlockSpec((B, n_chunks, hop_length), lambda i: (0, 0, 0)),
            pl.BlockSpec((n_fft, k2), lambda i: (0, 0)),
            pl.BlockSpec((k2, m_pad), lambda i: (0, 0)),
        ],
        out_specs=pl.BlockSpec((B, n_mels, F), lambda i: (0, 0, 0)),
        scratch_shapes=[pltpu.VMEM((B * F, n_fft), jnp.float32)],
        compiler_params=pltpu.CompilerParams(
            dimension_semantics=("arbitrary",)),
    )(xw, jnp.asarray(basis_pad), jnp.asarray(melfb_pad))


if __name__ == "__main__":
    key = jax.random.PRNGKey(0)
    batch, time = 2, 256
    n_fft, hop, n_mels, sr = 64, 16, 16, 16000
    x = jax.random.normal(key, (batch, time), dtype=jnp.float32)

    y = mel_spectrogram_fixed(x, sample_rate=sr, n_fft=n_fft,
                              hop_length=hop, n_mels=n_mels)
    y = jax.block_until_ready(y)

    assert y.shape == (batch, n_mels, time // hop), y.shape   # (2, 16, 16)
    assert y.dtype == jnp.float32
    assert bool(jnp.all(jnp.isfinite(y)))

    # --- plain-JAX reference (explicit gather framing) to validate the kernel path ---
    pad = n_fft // 2
    xp = jnp.pad(x, ((0, 0), (pad, pad)), mode="reflect")
    n_frames = 1 + (xp.shape[1] - n_fft) // hop
    idx = jnp.arange(n_frames)[:, None] * hop + jnp.arange(n_fft)[None, :]
    frames = xp[:, idx]                                            # (B, 17, 64)
    basis_ref = jnp.asarray(fused_dft_basis(n_fft, hann_window_periodic(n_fft)))
    melfb_ref = jnp.asarray(melscale_fbanks_htk(n_fft // 2 + 1, 0.0, sr / 2.0, n_mels, sr))
    yc = jnp.einsum("bfn,nk->bfk", frames, basis_ref,
                    precision=jax.lax.Precision.HIGHEST)
    nf = n_fft // 2 + 1
    power = yc[..., :nf] ** 2 + yc[..., nf:] ** 2
    mel = jnp.einsum("bfk,km->bfm", power, melfb_ref,
                     precision=jax.lax.Precision.HIGHEST)
    ref = jnp.log10(mel)
    ref = jnp.where(jnp.isinf(ref), 0.0, ref)
    ref = jnp.transpose(ref, (0, 2, 1))[..., :-1]
    assert jnp.allclose(y, ref, atol=1e-2, rtol=1e-2), \
        float(jnp.max(jnp.abs(y - ref)))

    print("KERNEL_OK")
</pallas_src>

<mosaic_0001>
module attributes {stable_mosaic.version = 11 : i64} {
  func.func @_melspec_kernel(%arg0: i32, %arg1: memref<2x20x16xf32, #tpu.memory_space<vmem>>, %arg2: memref<64x128xf32, #tpu.memory_space<vmem>>, %arg3: memref<128x128xf32, #tpu.memory_space<vmem>>, %arg4: memref<2x16x16xf32, #tpu.memory_space<vmem>>, %arg5: memref<32x64xf32, #tpu.memory_space<vmem>>) attributes {dimension_semantics = [#tpu.dimension_semantics<arbitrary>], iteration_bounds = array<i64: 1>, scalar_prefetch = 0 : i64, scratch_operands = 1 : i64, tpu.core_type = #tpu.core_type<tc>, window_params = [{pipeline_mode = #tpu.pipeline_mode<synchronous>, transform_indices = @transform_0, window_bounds = array<i64: 2, 20, 16>}, {pipeline_mode = #tpu.pipeline_mode<synchronous>, transform_indices = @transform_1, window_bounds = array<i64: 64, 128>}, {pipeline_mode = #tpu.pipeline_mode<synchronous>, transform_indices = @transform_2, window_bounds = array<i64: 128, 128>}, {pipeline_mode = #tpu.pipeline_mode<synchronous>, transform_indices = @transform_3, window_bounds = array<i64: 2, 16, 16>}]} {
    %c0 = arith.constant 0 : index
    %c0_0 = arith.constant 0 : index
    %c0_1 = arith.constant 0 : index
    %0 = vector.load %arg1[%c0, %c0_0, %c0_1] : memref<2x20x16xf32, #tpu.memory_space<vmem>>, vector<1x16x16xf32>
    %1 = vector.shape_cast %0 : vector<1x16x16xf32> to vector<16x16xf32>
    %c0_2 = arith.constant 0 : index
    %c0_3 = arith.constant 0 : index
    %2 = vector.load %arg5[%c0_2, %c0_3] : memref<32x64xf32, #tpu.memory_space<vmem>>, vector<16x16xf32>
    tpu.vector_store %arg5[%c0_2, %c0_3], %1 {strides = array<i32>} : memref<32x64xf32, #tpu.memory_space<vmem>>, vector<16x16xf32>,
    %c0_4 = arith.constant 0 : index
    %c1 = arith.constant 1 : index
    %c0_5 = arith.constant 0 : index
    %3 = vector.load %arg1[%c0_4, %c1, %c0_5] : memref<2x20x16xf32, #tpu.memory_space<vmem>>, vector<1x16x16xf32>
    %4 = vector.shape_cast %3 : vector<1x16x16xf32> to vector<16x16xf32>
    %c0_6 = arith.constant 0 : index
    %c16 = arith.constant 16 : index
    %5 = vector.load %arg5[%c0_6, %c16] : memref<32x64xf32, #tpu.memory_space<vmem>>, vector<16x16xf32>
    tpu.vector_store %arg5[%c0_6, %c16], %4 {strides = array<i32>} : memref<32x64xf32, #tpu.memory_space<vmem>>, vector<16x16xf32>,
    %c0_7 = arith.constant 0 : index
    %c2 = arith.constant 2 : index
    %c0_8 = arith.constant 0 : index
    %6 = vector.load %arg1[%c0_7, %c2, %c0_8] : memref<2x20x16xf32, #tpu.memory_space<vmem>>, vector<1x16x16xf32>
    %7 = vector.shape_cast %6 : vector<1x16x16xf32> to vector<16x16xf32>
    %c0_9 = arith.constant 0 : index
    %c32 = arith.constant 32 : index
    %8 = vector.load %arg5[%c0_9, %c32] : memref<32x64xf32, #tpu.memory_space<vmem>>, vector<16x16xf32>
    tpu.vector_store %arg5[%c0_9, %c32], %7 {strides = array<i32>} : memref<32x64xf32, #tpu.memory_space<vmem>>, vector<16x16xf32>,
    %c0_10 = arith.constant 0 : index
    %c3 = arith.constant 3 : index
    %c0_11 = arith.constant 0 : index
    %9 = vector.load %arg1[%c0_10, %c3, %c0_11] : memref<2x20x16xf32, #tpu.memory_space<vmem>>, vector<1x16x16xf32>
    %10 = vector.shape_cast %9 : vector<1x16x16xf32> to vector<16x16xf32>
    %c0_12 = arith.constant 0 : index
    %c48 = arith.constant 48 : index
    %11 = vector.load %arg5[%c0_12, %c48] : memref<32x64xf32, #tpu.memory_space<vmem>>, vector<16x16xf32>
    tpu.vector_store %arg5[%c0_12, %c48], %10 {strides = array<i32>} : memref<32x64xf32, #tpu.memory_space<vmem>>, vector<16x16xf32>,
    %c1_13 = arith.constant 1 : index
    %c0_14 = arith.constant 0 : index
    %c0_15 = arith.constant 0 : index
    %12 = vector.load %arg1[%c1_13, %c0_14, %c0_15] : memref<2x20x16xf32, #tpu.memory_space<vmem>>, vector<1x16x16xf32>
    %13 = vector.shape_cast %12 : vector<1x16x16xf32> to vector<16x16xf32>
    %c16_16 = arith.constant 16 : index
    %c0_17 = arith.constant 0 : index
    %14 = vector.load %arg5[%c16_16, %c0_17] : memref<32x64xf32, #tpu.memory_space<vmem>>, vector<16x16xf32>
    tpu.vector_store %arg5[%c16_16, %c0_17], %13 {strides = array<i32>} : memref<32x64xf32, #tpu.memory_space<vmem>>, vector<16x16xf32>,
    %c1_18 = arith.constant 1 : index
    %c1_19 = arith.constant 1 : index
    %c0_20 = arith.constant 0 : index
    %15 = vector.load %arg1[%c1_18, %c1_19, %c0_20] : memref<2x20x16xf32, #tpu.memory_space<vmem>>, vector<1x16x16xf32>
    %16 = vector.shape_cast %15 : vector<1x16x16xf32> to vector<16x16xf32>
    %c16_21 = arith.constant 16 : index
    %c16_22 = arith.constant 16 : index
    %17 = vector.load %arg5[%c16_21, %c16_22] : memref<32x64xf32, #tpu.memory_space<vmem>>, vector<16x16xf32>
    tpu.vector_store %arg5[%c16_21, %c16_22], %16 {strides = array<i32>} : memref<32x64xf32, #tpu.memory_space<vmem>>, vector<16x16xf32>,
    %c1_23 = arith.constant 1 : index
    %c2_24 = arith.constant 2 : index
    %c0_25 = arith.constant 0 : index
    %18 = vector.load %arg1[%c1_23, %c2_24, %c0_25] : memref<2x20x16xf32, #tpu.memory_space<vmem>>, vector<1x16x16xf32>
    %19 = vector.shape_cast %18 : vector<1x16x16xf32> to vector<16x16xf32>
    %c16_26 = arith.constant 16 : index
    %c32_27 = arith.constant 32 : index
    %20 = vector.load %arg5[%c16_26, %c32_27] : memref<32x64xf32, #tpu.memory_space<vmem>>, vector<16x16xf32>
    tpu.vector_store %arg5[%c16_26, %c32_27], %19 {strides = array<i32>} : memref<32x64xf32, #tpu.memory_space<vmem>>, vector<16x16xf32>,
    %c1_28 = arith.constant 1 : index
    %c3_29 = arith.constant 3 : index
    %c0_30 = arith.constant 0 : index
    %21 = vector.load %arg1[%c1_28, %c3_29, %c0_30] : memref<2x20x16xf32, #tpu.memory_space<vmem>>, vector<1x16x16xf32>
    %22 = vector.shape_cast %21 : vector<1x16x16xf32> to vector<16x16xf32>
    %c16_31 = arith.constant 16 : index
    %c48_32 = arith.constant 48 : index
    %23 = vector.load %arg5[%c16_31, %c48_32] : memref<32x64xf32, #tpu.memory_space<vmem>>, vector<16x16xf32>
    tpu.vector_store %arg5[%c16_31, %c48_32], %22 {strides = array<i32>} : memref<32x64xf32, #tpu.memory_space<vmem>>, vector<16x16xf32>,
    %c0_33 = arith.constant 0 : index
    %c0_34 = arith.constant 0 : index
    %24 = vector.load %arg5[%c0_33, %c0_34] : memref<32x64xf32, #tpu.memory_space<vmem>>, vector<32x64xf32>
    %c0_35 = arith.constant 0 : index
    %c0_36 = arith.constant 0 : index
    %25 = vector.load %arg2[%c0_35, %c0_36] : memref<64x128xf32, #tpu.memory_space<vmem>>, vector<64x128xf32>
    %cst = arith.constant dense<0.000000e+00> : vector<32x128xf32>
    %26 = tpu.matmul %24, %25, %cst {dimension_numbers = #tpu.dot_dimension_numbers<[1], [0], [0], [1], [0, 0, 1, 1], [], []>, precision = #tpu.contract_precision<fp32>} : vector<32x64xf32>, vector<64x128xf32>, vector<32x128xf32> -> vector<32x128xf32>
    %27 = arith.mulf %26, %26 : vector<32x128xf32>
    %c0_37 = arith.constant 0 : index
    %c0_38 = arith.constant 0 : index
    %28 = vector.load %arg3[%c0_37, %c0_38] : memref<128x128xf32, #tpu.memory_space<vmem>>, vector<128x128xf32>
    %cst_39 = arith.constant dense<0.000000e+00> : vector<32x128xf32>
    %29 = tpu.matmul %27, %28, %cst_39 {dimension_numbers = #tpu.dot_dimension_numbers<[1], [0], [0], [1], [0, 0, 1, 1], [], []>, precision = #tpu.contract_precision<fp32>} : vector<32x128xf32>, vector<128x128xf32>, vector<32x128xf32> -> vector<32x128xf32>
    %30 = math.log %29 : vector<32x128xf32>
    %cst_40 = arith.constant 0.434294492 : f32
    %31 = vector.broadcast %cst_40 : f32 to vector<32x128xf32>
    %32 = arith.mulf %30, %31 : vector<32x128xf32>
    %33 = math.absf %32 : vector<32x128xf32>
    %cst_41 = arith.constant 0x7F800000 : f32
    %34 = vector.broadcast %cst_41 : f32 to vector<32x128xf32>
    %35 = arith.cmpf oeq, %33, %34 : vector<32x128xf32>
    %cst_42 = arith.constant 0.000000e+00 : f32
    %36 = vector.broadcast %cst_42 : f32 to vector<32x128xf32>
    %37 = arith.select %35, %36, %32 : vector<32x128xi1>, vector<32x128xf32>
    %38 = tpu.transpose %37, [1, 0] : vector<32x128xf32> -> vector<128x32xf32>
    %39 = vector.extract_strided_slice %38 {offsets = [0, 0], sizes = [16, 16], strides = [1, 1]} : vector<128x32xf32> to vector<16x16xf32>
    %c0_43 = arith.constant 0 : index
    %c0_44 = arith.constant 0 : index
    %c0_45 = arith.constant 0 : index
    %40 = vector.load %arg4[%c0_43, %c0_44, %c0_45] : memref<2x16x16xf32, #tpu.memory_space<vmem>>, vector<1x16x16xf32>
    %41 = vector.shape_cast %40 : vector<1x16x16xf32> to vector<16x16xf32>
    %42 = vector.shape_cast %39 : vector<16x16xf32> to vector<1x16x16xf32>
    tpu.vector_store %arg4[%c0_43, %c0_44, %c0_45], %42 {strides = array<i32>} : memref<2x16x16xf32, #tpu.memory_space<vmem>>, vector<1x16x16xf32>,
    %43 = vector.extract_strided_slice %38 {offsets = [0, 16], sizes = [16, 16], strides = [1, 1]} : vector<128x32xf32> to vector<16x16xf32>
    %c1_46 = arith.constant 1 : index
    %c0_47 = arith.constant 0 : index
    %c0_48 = arith.constant 0 : index
    %44 = vector.load %arg4[%c1_46, %c0_47, %c0_48] : memref<2x16x16xf32, #tpu.memory_space<vmem>>, vector<1x16x16xf32>
    %45 = vector.shape_cast %44 : vector<1x16x16xf32> to vector<16x16xf32>
    %46 = vector.shape_cast %43 : vector<16x16xf32> to vector<1x16x16xf32>
    tpu.vector_store %arg4[%c1_46, %c0_47, %c0_48], %46 {strides = array<i32>} : memref<2x16x16xf32, #tpu.memory_space<vmem>>, vector<1x16x16xf32>,
    return
  }
  func.func @transform_0(%arg0: i32) -> (i32, i32, i32) {
    %c0_i32 = arith.constant 0 : i32
    %c0_i32_0 = arith.constant 0 : i32
    %c0_i32_1 = arith.constant 0 : i32
    %c0_i32_2 = arith.constant 0 : i32
    return %c0_i32, %c0_i32_0, %c0_i32_1 : i32, i32, i32
  }
  func.func @transform_1(%arg0: i32) -> (i32, i32) {
    %c0_i32 = arith.constant 0 : i32
    %c0_i32_0 = arith.constant 0 : i32
    %c0_i32_1 = arith.constant 0 : i32
    return %c0_i32, %c0_i32_0 : i32, i32
  }
  func.func @transform_2(%arg0: i32) -> (i32, i32) {
    %c0_i32 = arith.constant 0 : i32
    %c0_i32_0 = arith.constant 0 : i32
    %c0_i32_1 = arith.constant 0 : i32
    return %c0_i32, %c0_i32_0 : i32, i32
  }
  func.func @transform_3(%arg0: i32) -> (i32, i32, i32) {
    %c0_i32 = arith.constant 0 : i32
    %c0_i32_0 = arith.constant 0 : i32
    %c0_i32_1 = arith.constant 0 : i32
    %c0_i32_2 = arith.constant 0 : i32
    return %c0_i32, %c0_i32_0, %c0_i32_1 : i32, i32, i32
  }
}

</mosaic_0001>

<bundles_post_ra>
// kernel: mel_spectrogram_fixed.1
= control target key start
LH: loop header
LB: loop body
LE: loop exit
PB: predicated region body
PF: predicated region fallthrough
CT: control target
= control target key end

     0   :  { %8 = vsyncpa [#allocation4], 0  ;;  %s1520_s0 = inlined_call_operand.vmem [shape: f32[2,20,16], index: 0, kind: input, shape index: {}]   ;;  %s1521_s1 = inlined_call_operand.vmem [shape: f32[64,128], index: 1, kind: input, shape index: {}]   ;;  %s1522_s2 = inlined_call_operand.hbm [shape: f32[128,128], index: 2, kind: input, shape index: {}]   ;;  %s1523_s3 = inlined_call_operand.hbm [shape: f32[2,16,16], index: 3, kind: output, shape index: {}]  }
   0x1   :  { %9 = vsyncpa [#allocation5], 0  ;;  %s18_s14 = sshll.u32 %s1522_s2, 4  ;;  %s1090_s15 = smov [#allocation3]   ;;  %s19_s14 = int_to_ptr.hbm [resolvable:$true] %s18_s14 }
   0x2   :  { %s20_s16 = sshll.u32 %s1090_s15, 4  ;;  %s1091_s17 = smov 128   ;;  %s21_s16 = int_to_ptr.vmem [resolvable:$true] %s20_s16 }
   0x3   :  { %s1092_s18 = smov 8  }
   0x4   :  { %26 = dma.hbm_to_vmem [thread:$0]  %s19_s14, 2048, %s21_s16, [#allocation4], %s1091_s17, %s1091_s17, %s1092_s18  }
   0x5   :  { %1086 = dma.done.wait [#allocation4], 2048  }
   0x6   :  { %1087 = vsyncadd [#allocation4], 4294965248  ;;  %v62_v0 = vld [vmem:[%s1520_s0 + $0x3] sm:$0xff]  ;;  %s1093_s2 = smov 48   ;;  %s1094_s23 = smov 16   ;;  %v63_v5 = vld [vmem:[%s1520_s0 + $0xb] sm:$0xff] }
   0x7   :  { %v36_v1 = vld [vmem:[%s1520_s0 + $0x1] sm:$0xff]  ;;  %66 = vrot.lane.b32.xlu1 %v62_v0, %s1093_s2  ;;  %v50_v2 = vld [vmem:[%s1520_s0 + $0xa] sm:$0xff]  ;;  %s1095_s26 = smov 32   ;;  %v1015_v6 = vld [vmem:[%s1520_s0 + $0x19] sm:$0xff]  ;;  %vm33_vm0 = vcmask 130048   ;;  %vm46_vm1 = vcmask 261248  }
   0x8   :  { %40 = vrot.lane.b32.xlu0 %v36_v1, %s1094_s23  ;;  %55 = vrot.lane.b32.xlu2 %v50_v2, %s1095_s26  ;;  %v37_v3 = vld [vmem:[%s1520_s0 + $0x9] sm:$0xff]  ;;  %v1017_v7 = vld [vmem:[%s1520_s0 + $0x1a] sm:$0xff]  ;;  %vm59_vm2 = vcmask 392448   ;;  %vm72_vm3 = vcmask 523648   ;;  %vm128_vm4 = vcmask 523264   ;;  %s1097_s15 = smov [#allocation6]  }
   0x9   :  { %v49_v4 = vld [vmem:[%s1520_s0 + $0x2] sm:$0xff]  ;;  %v127_v12 = vld [vmem:[%s1521_s1 + $0x38] sm:$0xff]  ;;  %v126_v14 = vld [vmem:[%s1521_s1 + $0x30] sm:$0xff]  ;;  %s998_s16 = sshll.u32 %s1097_s15, 4  ;;  %s1000_s21 = sshll.u32 %s1523_s3, 4  ;;  %s999_s16 = int_to_ptr.vmem [resolvable:$true] %s998_s16  ;;  %s1001_s21 = int_to_ptr.hbm [resolvable:$true] %s1000_s21 }
   0xa   :  { %v1019_v8 = vld [vmem:[%s1520_s0 + $0x1b] sm:$0xff]  ;;  %v1020_v11 = vld [vmem:[%s1520_s0 + $0x23] sm:$0xff]  ;;  %v1163_v13 = vand.u32 4294901760, %v127_v12  ;;  %v1171_v16 = vand.u32 4294901760, %v126_v14  ;;  %v122_v35 = vld [vmem:[%s1521_s1 + $0x10] sm:$0xff] }
   0xb   :  { %v1016_v9 = vld [vmem:[%s1520_s0 + $0x21] sm:$0xff]  ;;  %v123_v29 = vld [vmem:[%s1521_s1 + $0x18] sm:$0xff]  ;;  %v1228_v39 = vand.u32 4294901760, %v122_v35 }
   0xc   :  { %v1018_v10 = vld [vmem:[%s1520_s0 + $0x22] sm:$0xff]  ;;  %v1169_v15 = vsub.f32 %v127_v12, %v1163_v13  ;;  %333 = vmatpush.msra.mxu3 %v1163_v13  ;;  %150 = vmatpush.msra.mxu0 %v1163_v13  ;;  %v1181_v19 = vsub.f32 %v126_v14, %v1171_v16  ;;  %v1215_v33 = vand.u32 4294901760, %v123_v29  ;;  %v1013_v52 = vld [vmem:[%s1520_s0 + $0x18] sm:$0xff] }
   0xd   :  { %v31_v17 = vld [vmem:[%s1520_s0] sm:$0xff]  ;;  %v125_v20 = vld [vmem:[%s1521_s1 + $0x28] sm:$0xff]  ;;  %v237_v45 = vsub.f32 %v122_v35, %v1228_v39  ;;  %78 = vst.msk [vmem:[#allocation2 + $0x10] sm:$0xff] %vm33_vm0, %v1013_v52 }
   0xe   :  { %34 = vst.msk [vmem:[#allocation2] sm:$0xff] %vm33_vm0, %v31_v17  ;;  %v208_v18 = vand.u32 4294901760, %v1169_v15  ;;  %281 = vmatpush.msra.mxu2 %v1169_v15  ;;  %335 = vmatpush.msra.mxu3 %v1171_v16  ;;  %v214_v22 = vand.u32 4294901760, %v1181_v19  ;;  %v1193_v23 = vand.u32 4294901760, %v125_v20  ;;  %v124_v24 = vld [vmem:[%s1521_s1 + $0x20] sm:$0xff]  ;;  %v32_v34 = vld [vmem:[%s1520_s0 + $0x8] sm:$0xff]  ;;  %v231_v38 = vsub.f32 %v123_v29, %v1215_v33 }
   0xf   :  { %42 = vrot.lane.b32.xlu1 %v37_v3, %s1094_s23  ;;  %152 = vmatpush.msra.mxu0 %v1171_v16  ;;  %v1205_v28 = vand.u32 4294901760, %v124_v24  ;;  %35 = vst.msk [vmem:[#allocation2 + $0x8] sm:$0xff] %vm33_vm0, %v32_v34  ;;  %v121_v40 = vld [vmem:[%s1521_s1 + $0x8] sm:$0xff]  ;;  %v120_v46 = vld [vmem:[%s1521_s1] sm:$0xff]  ;;  %v238_v51 = vand.u32 4294901760, %v237_v45 }
  0x10   :  { %53 = vrot.lane.b32.xlu0 %v49_v4, %s1095_s26  ;;  %68 = vrot.lane.b32.xlu2 %v63_v5, %s1093_s2  ;;  %v209_v21 = vsub.f32 %v1169_v15, %v208_v18  ;;  %v215_v26 = vsub.f32 %v1181_v19, %v214_v22  ;;  %v1203_v27 = vsub.f32 %v125_v20, %v1193_v23  ;;  %v232_v43 = vand.u32 4294901760, %v231_v38  ;;  %v1014_v0 = vld [vmem:[%s1520_s0 + $0x20] sm:$0xff]  ;;  %s1096_s0 = smov 112  }
  0x11   :  { %284 = vmatpush.msra.mxu2 %v1181_v19  ;;  %337 = vmatpush.msra.mxu3 %v1193_v23  ;;  %v225_v32 = vsub.f32 %v124_v24, %v1205_v28  ;;  %v161_v44 = vand.u32 4294901760, %v121_v40  ;;  %v163_v50 = vand.u32 4294901760, %v120_v46  ;;  %v239_v56 = vsub.f32 %v237_v45, %v238_v51  ;;  %79 = vst.msk [vmem:[#allocation2 + $0x18] sm:$0xff] %vm33_vm0, %v1014_v0 }
  0x12   :  { %v210_v25 = vand.u32 4294901760, %v209_v21  ;;  %154 = vmatpush.msra.mxu0 %v1193_v23  ;;  %v216_v30 = vand.u32 4294901760, %v215_v26  ;;  %v220_v31 = vand.u32 4294901760, %v1203_v27  ;;  %v233_v48 = vsub.f32 %v231_v38, %v232_v43 }
  0x13   :  { %287 = vmatpush.msra.mxu2 %v1203_v27  ;;  %339 = vmatpush.msra.mxu3 %v1205_v28  ;;  %v226_v37 = vand.u32 4294901760, %v225_v32  ;;  %v243_v49 = vsub.f32 %v121_v40, %v161_v44  ;;  %v249_v55 = vsub.f32 %v120_v46, %v163_v50  ;;  %v240_v59 = vand.u32 4294901760, %v239_v56  ;;  %v490_v40 = vld [vmem:[#allocation3 + $0x78] sm:$0xff] }
  0x14   :  { %211 = vmatpush.msra.mxu1 %v210_v25  ;;  %156 = vmatpush.msra.mxu0 %v1205_v28  ;;  %v221_v36 = vsub.f32 %v1203_v27, %v220_v31  ;;  %v234_v53 = vand.u32 4294901760, %v233_v48 }
  0x15   :  { %290 = vmatpush.msra.mxu2 %v225_v32  ;;  %341 = vmatpush.msra.mxu3 %v1215_v33  ;;  %v227_v42 = vsub.f32 %v225_v32, %v226_v37  ;;  %v244_v54 = vand.u32 4294901760, %v243_v49  ;;  %v250_v58 = vand.u32 4294901760, %v249_v55 }
  0x16   :  { %217 = vmatpush.msra.mxu1 %v216_v30  ;;  %158 = vmatpush.msra.mxu0 %v1215_v33  ;;  %v222_v41 = vand.u32 4294901760, %v221_v36 }
  0x17   :  { %96 = vrot.lane.b32.xlu1 %v1017_v7, %s1095_s26  ;;  %293 = vmatpush.msra.mxu2 %v231_v38  ;;  %v228_v47 = vand.u32 4294901760, %v227_v42  ;;  %v245_v57 = vsub.f32 %v243_v49, %v244_v54  ;;  %v251_v61 = vsub.f32 %v249_v55, %v250_v58  ;;  %v489_v42 = vld [vmem:[#allocation3 + $0x70] sm:$0xff] }
  0x18   :  { %84 = vrot.lane.b32.xlu0 %v1015_v6, %s1094_s23  ;;  %108 = vrot.lane.b32.xlu2 %v1019_v8, %s1093_s2 }
  0x19   :  { %343 = vmatpush.msra.mxu3 %v1228_v39  ;;  %160 = vmatpush.msra.mxu0 %v1228_v39  ;;  %v246_v60 = vand.u32 4294901760, %v245_v57  ;;  %v252_v62 = vand.u32 4294901760, %v251_v61 }
  0x1a   :  { %223 = vmatpush.msra.mxu1 %v222_v41  ;;  %296 = vmatpush.msra.mxu2 %v237_v45  ;;  %v1275_v41 = vand.u32 4294901760, %v490_v40  ;;  %v488_v45 = vld [vmem:[#allocation3 + $0x68] sm:$0xff] }
  0x1b   :  { %345 = vmatpush.msra.mxu3 %v161_v44  ;;  %162 = vmatpush.msra.mxu0 %v161_v44  ;;  %v1289_v48 = vand.u32 4294901760, %v488_v45 }
  0x1c   :  { %229 = vmatpush.msra.mxu1 %v228_v47  ;;  %299 = vmatpush.msra.mxu2 %v243_v49  ;;  %v487_v49 = vld [vmem:[#allocation3 + $0x60] sm:$0xff] }
  0x1d   :  { %347 = vmatpush.msra.mxu3 %v163_v50  ;;  %164 = vmatpush.msra.mxu0 %v163_v50  ;;  %v1298_v52 = vsub.f32 %v488_v45, %v1289_v48 }
  0x1e   :  { %235 = vmatpush.msra.mxu1 %v234_v53  ;;  %302 = vmatpush.msra.mxu2 %v249_v55  ;;  %v1301_v53 = vand.u32 4294901760, %v487_v49 }
  0x1f   :  { %98 = vrot.lane.b32.xlu1 %v1018_v10, %s1095_s26  ;;  %384 = vmatpush.msrb.mxu0 %v208_v18  ;;  %v570_v57 = vand.u32 4294901760, %v1298_v52 }
  0x20   :  { %86 = vrot.lane.b32.xlu0 %v1016_v9, %s1094_s23  ;;  %110 = vrot.lane.b32.xlu2 %v1020_v11, %s1093_s2 }
  0x21   :  { %241 = vmatpush.msra.mxu1 %v240_v59  ;;  %388 = vmatpush.msrb.mxu0 %v214_v22 }
  0x22   :  { %492 = vmatpush.msrb.mxu2 %v1275_v41 }
  0x23   :  { %247 = vmatpush.msra.mxu1 %v246_v60  ;;  %392 = vmatpush.msrb.mxu0 %v220_v31  ;;  %v485_v60 = vld [vmem:[#allocation3 + $0x50] sm:$0xff] }
  0x24   :  { %v1322_v0 = vand.u32 4294901760, %v485_v60 }
  0x25   :  { %253 = vmatpush.msra.mxu1 %v252_v62  ;;  %396 = vmatpush.msrb.mxu0 %v226_v37  ;;  %v571_v62 = vsub.f32 %v1298_v52, %v570_v57 }
  0x27   :  { %439 = vmatpush.msrb.mxu1 %v1163_v13  ;;  %400 = vmatpush.msrb.mxu0 %v232_v43  ;;  %v1278_v43 = vsub.f32 %v490_v40, %v1275_v41 }
  0x29   :  { %441 = vmatpush.msrb.mxu1 %v1171_v16  ;;  %404 = vmatpush.msrb.mxu0 %v238_v51  ;;  %v558_v46 = vand.u32 4294901760, %v1278_v43 }
  0x2b   :  { %443 = vmatpush.msrb.mxu1 %v1193_v23  ;;  %408 = vmatpush.msrb.mxu0 %v244_v54  ;;  %v486_v54 = vld [vmem:[#allocation3 + $0x58] sm:$0xff] }
  0x2c   :  { %v1314_v59 = vand.u32 4294901760, %v486_v54 }
  0x2d   :  { %445 = vmatpush.msrb.mxu1 %v1205_v28  ;;  %412 = vmatpush.msrb.mxu0 %v250_v58  ;;  %v1310_v58 = vsub.f32 %v487_v49, %v1301_v53 }
  0x2f   :  { %447 = vmatpush.msrb.mxu1 %v1215_v33 }
  0x31   :  { %449 = vmatpush.msrb.mxu1 %v1228_v39 }
  0x33   :  { %451 = vmatpush.msrb.mxu1 %v161_v44  ;;  %v1280_v44 = vand.u32 4294901760, %v489_v42 }
  0x35   :  { %453 = vmatpush.msrb.mxu1 %v163_v50  ;;  %v1286_v47 = vsub.f32 %v489_v42, %v1280_v44  ;;  %494 = vmatpush.msrb.mxu2 %v1280_v44  ;;  %v559_v50 = vsub.f32 %v1278_v43, %v558_v46 }
  0x37   :  { %v564_v51 = vand.u32 4294901760, %v1286_v47  ;;  %496 = vmatpush.msrb.mxu2 %v1289_v48  ;;  %v560_v55 = vand.u32 4294901760, %v559_v50 }
  0x39   :  { %v565_v56 = vsub.f32 %v1286_v47, %v564_v51  ;;  %498 = vmatpush.msrb.mxu2 %v1301_v53  ;;  %561 = vmatpush.msrb.mxu3 %v560_v55 }
  0x3b   :  { %v566_v61 = vand.u32 4294901760, %v565_v56  ;;  %500 = vmatpush.msrb.mxu2 %v1314_v59 }
  0x3d   :  { %567 = vmatpush.msrb.mxu3 %v566_v61  ;;  %502 = vmatpush.msrb.mxu2 %v1322_v0 }
  0x62   :  { %v56_v63 = vpop.permute.xlu2 %55 }
  0x6a   :  { %v69_v3 = vpop.permute.xlu2 %68 }
  0x72   :  { %v109_v6 = vpop.permute.xlu2 %108 }
  0x79   :  { %v67_v1 = vpop.permute.xlu1 %66 }
  0x7a   :  { %v41_v2 = vpop.permute.xlu0 %40  ;;  %v111_v16 = vpop.permute.xlu2 %110 }
  0x7b   :  { %47 = vst.msk [vmem:[#allocation2] sm:$0xff] %vm46_vm1, %v41_v2  ;;  %v484_v2 = vld [vmem:[#allocation3 + $0x48] sm:$0xff] }
  0x81   :  { %v43_v4 = vpop.permute.xlu1 %42 }
  0x82   :  { %v54_v5 = vpop.permute.xlu0 %53  ;;  %48 = vst.msk [vmem:[#allocation2 + $0x8] sm:$0xff] %vm46_vm1, %v43_v4 }
  0x83   :  { %60 = vst.msk [vmem:[#allocation2] sm:$0xff] %vm59_vm2, %v54_v5  ;;  %v1333_v5 = vsub.f32 %v485_v60, %v1322_v0 }
  0x84   :  { %73 = vst.msk [vmem:[#allocation2] sm:$0xff] %vm72_vm3, %v67_v1  ;;  %v1325_v1 = vsub.f32 %v486_v54, %v1314_v59  ;;  %v477_v54 = vld [vmem:[#allocation3 + $0x10] sm:$0xff] }
  0x85   :  { %61 = vst.msk [vmem:[#allocation2 + $0x8] sm:$0xff] %vm59_vm2, %v56_v63  ;;  %v576_v63 = vand.u32 4294901760, %v1310_v58  ;;  %v1420_v61 = vand.u32 4294901760, %v477_v54 }
  0x86   :  { %74 = vst.msk [vmem:[#allocation2 + $0x8] sm:$0xff] %vm72_vm3, %v69_v3  ;;  %v572_v3 = vand.u32 4294901760, %v571_v62 }
  0x87   :  { %v577_v4 = vsub.f32 %v1310_v58, %v576_v63 }
  0x88   :  { %573 = vmatpush.msrb.mxu3 %v572_v3 }
  0x89   :  { %v97_v8 = vpop.permute.xlu1 %96 }
  0x8a   :  { %v85_v7 = vpop.permute.xlu0 %84 }
  0x8b   :  { %90 = vst.msk [vmem:[#allocation2 + $0x10] sm:$0xff] %vm46_vm1, %v85_v7  ;;  %v116_v9 = vld [vmem:[#allocation2] sm:$0xff]  ;;  %v582_v7 = vand.u32 4294901760, %v1325_v1 }
  0x8c   :  { %102 = vst.msk [vmem:[#allocation2 + $0x10] sm:$0xff] %vm59_vm2, %v97_v8  ;;  %v130_v10 = vsel %vm128_vm4, %v116_v9, 0  ;;  %v483_v8 = vld [vmem:[#allocation3 + $0x40] sm:$0xff]  ;;  %v578_v9 = vand.u32 4294901760, %v577_v4 }
  0x8d   :  { %114 = vst.msk [vmem:[#allocation2 + $0x10] sm:$0xff] %vm72_vm3, %v109_v6  ;;  %v165_v11 = vand.u32 4294901760, %v130_v10  ;;  %v117_v12 = vld [vmem:[#allocation2 + $0x8] sm:$0xff]  ;;  %v1335_v6 = vand.u32 4294901760, %v484_v2 }
  0x8e   :  { %v133_v13 = vsel %vm128_vm4, %v117_v12, 0  ;;  %v1344_v12 = vand.u32 4294901760, %v483_v8  ;;  %579 = vmatpush.msrb.mxu3 %v578_v9  ;;  %v1430_v9 = vsub.f32 %v477_v54, %v1420_v61 }
  0x8f   :  { %255 = vmatmul.f32.vlgmr.msra.gmra.mxu1 %v165_v11  ;;  %v166_v14 = vsub.f32 %v130_v10, %v165_v11  ;;  %v173_v15 = vand.u32 4294901760, %v133_v13  ;;  %v588_v10 = vand.u32 4294901760, %v1333_v5  ;;  %504 = vmatpush.msrb.mxu2 %v1335_v6 }
  0x90   :  { %739 = vmatpush.msra.mxu1 %v1275_v41 }
  0x91   :  { %305 = vmatmul.f32.vlgmr.msra.gmra.mxu2 %v166_v14  ;;  %v167_v17 = vand.u32 4294901760, %v166_v14  ;;  %v99_v19 = vpop.permute.xlu1 %98  ;;  %v174_v20 = vsub.f32 %v133_v13, %v173_v15  ;;  %v583_v13 = vsub.f32 %v1325_v1, %v582_v7 }
  0x92   :  { %v87_v18 = vpop.permute.xlu0 %86  ;;  %741 = vmatpush.msra.mxu1 %v1280_v44  ;;  %506 = vmatpush.msrb.mxu2 %v1344_v12 }
  0x93   :  { %91 = vst.msk [vmem:[#allocation2 + $0x18] sm:$0xff] %vm46_vm1, %v87_v18  ;;  %351 = vmatmul.f32.vlgmr.msra.gmra.mxu3 %v167_v17  ;;  %v168_v21 = vsub.f32 %v166_v14, %v167_v17  ;;  %v175_v25 = vand.u32 4294901760, %v174_v20  ;;  %v482_v14 = vld [vmem:[#allocation3 + $0x38] sm:$0xff]  ;;  %v1357_v17 = vsub.f32 %v483_v8, %v1344_v12 }
  0x94   :  { %103 = vst.msk [vmem:[#allocation2 + $0x18] sm:$0xff] %vm59_vm2, %v99_v19  ;;  %v118_v22 = vld [vmem:[#allocation2 + $0x10] sm:$0xff]  ;;  %743 = vmatpush.msra.mxu1 %v1289_v48  ;;  %v1359_v18 = vand.u32 4294901760, %v482_v14  ;;  %v584_v19 = vand.u32 4294901760, %v583_v13 }
  0x95   :  { %115 = vst.msk [vmem:[#allocation2 + $0x18] sm:$0xff] %vm72_vm3, %v111_v16  ;;  %v136_v23 = vsel %vm128_vm4, %v118_v22, 0  ;;  %v169_v24 = vand.u32 4294901760, %v168_v21  ;;  %v176_v27 = vsub.f32 %v174_v20, %v175_v25 }
  0x96   :  { %v181_v26 = vand.u32 4294901760, %v136_v23  ;;  %745 = vmatpush.msra.mxu1 %v1301_v53  ;;  %585 = vmatpush.msrb.mxu3 %v584_v19 }
  0x97   :  { %170 = vmatmul.f32.vlgmr.msra.gmra.mxu0 %v169_v24  ;;  %259 = vmatmul.f32.gmra.mxu1 %v173_v15  ;;  %v177_v31 = vand.u32 4294901760, %v176_v27  ;;  %v1369_v24 = vsub.f32 %v482_v14, %v1359_v18  ;;  %v475_v14 = vld [vmem:[#allocation3] sm:$0xff] }
  0x98   :  { %v182_v28 = vsub.f32 %v136_v23, %v181_v26  ;;  %671 = vmatpush.msra.mxu0 %v1278_v43  ;;  %747 = vmatpush.msra.mxu1 %v1314_v59  ;;  %v600_v23 = vand.u32 4294901760, %v1357_v17 }
  0x99   :  { %310 = vmatmul.f32.gmra.mxu2 %v174_v20  ;;  %v481_v20 = vld [vmem:[#allocation3 + $0x30] sm:$0xff] }
  0x9a   :  { %v183_v32 = vand.u32 4294901760, %v182_v28  ;;  %674 = vmatpush.msra.mxu0 %v1286_v47  ;;  %749 = vmatpush.msra.mxu1 %v1322_v0 }
  0x9b   :  { %357 = vmatmul.f32.gmra.mxu3 %v175_v25  ;;  %v1373_v25 = vand.u32 4294901760, %v481_v20  ;;  %508 = vmatpush.msrb.mxu2 %v1359_v18 }
  0x9c   :  { %v119_v29 = vld [vmem:[#allocation2 + $0x18] sm:$0xff]  ;;  %v184_v34 = vsub.f32 %v182_v28, %v183_v32  ;;  %677 = vmatpush.msra.mxu0 %v1298_v52  ;;  %751 = vmatpush.msra.mxu1 %v1335_v6 }
  0x9d   :  { %v139_v30 = vsel %vm128_vm4, %v119_v29, 0  ;;  %v606_v29 = vand.u32 4294901760, %v1369_v24  ;;  %510 = vmatpush.msrb.mxu2 %v1373_v25 }
  0x9e   :  { %v189_v33 = vand.u32 4294901760, %v139_v30  ;;  %v185_v36 = vand.u32 4294901760, %v184_v34  ;;  %680 = vmatpush.msra.mxu0 %v1310_v58  ;;  %753 = vmatpush.msra.mxu1 %v1344_v12 }
  0x9f   :  { %178 = vmatmul.f32.gmra.mxu0 %v177_v31  ;;  %263 = vmatmul.f32.gmra.mxu1 %v181_v26  ;;  %v1384_v31 = vsub.f32 %v481_v20, %v1373_v25  ;;  %v607_v34 = vsub.f32 %v1369_v24, %v606_v29  ;;  %v636_v20 = vand.u32 4294901760, %v1430_v9 }
  0xa0   :  { %v190_v35 = vsub.f32 %v139_v30, %v189_v33  ;;  %683 = vmatpush.msra.mxu0 %v1325_v1  ;;  %755 = vmatpush.msra.mxu1 %v1359_v18 }
  0xa1   :  { %315 = vmatmul.f32.gmra.mxu2 %v182_v28  ;;  %v601_v28 = vsub.f32 %v1357_v17, %v600_v23  ;;  %v608_v40 = vand.u32 4294901760, %v607_v34 }
  0xa2   :  { %v191_v37 = vand.u32 4294901760, %v190_v35  ;;  %686 = vmatpush.msra.mxu0 %v1333_v5  ;;  %757 = vmatpush.msra.mxu1 %v1373_v25 }
  0xa3   :  { %363 = vmatmul.f32.gmra.mxu3 %v183_v32  ;;  %v479_v32 = vld [vmem:[#allocation3 + $0x20] sm:$0xff] }
  0xa4   :  { %v192_v38 = vsub.f32 %v190_v35, %v191_v37 }
  0xa6   :  { %v193_v39 = vand.u32 4294901760, %v192_v38  ;;  %v612_v38 = vand.u32 4294901760, %v1384_v31 }
  0xa7   :  { %186 = vmatmul.f32.gmra.mxu0 %v185_v36  ;;  %267 = vmatmul.f32.gmra.mxu1 %v189_v33  ;;  %v1393_v36 = vand.u32 4294901760, %v479_v32 }
  0xa8   :  { %v613_v50 = vsub.f32 %v1384_v31, %v612_v38 }
  0xa9   :  { %320 = vmatmul.f32.gmra.mxu2 %v190_v35  ;;  %v1403_v45 = vsub.f32 %v479_v32, %v1393_v36  ;;  %v637_v32 = vsub.f32 %v1430_v9, %v636_v20 }
  0xaa   :  { %v614_v62 = vand.u32 4294901760, %v613_v50 }
  0xab   :  { %369 = vmatmul.f32.gmra.mxu3 %v191_v37  ;;  %v624_v56 = vand.u32 4294901760, %v1403_v45 }
  0xad   :  { %v625_v4 = vsub.f32 %v1403_v45, %v624_v56 }
  0xaf   :  { %194 = vmatmul.f32.gmra.mxu0 %v193_v39  ;;  %455 = vmatmul.f32.vlgmr.msrb.gmra.mxu1 %v165_v11  ;;  %v478_v39 = vld [vmem:[#allocation3 + $0x18] sm:$0xff] }
  0xb0   :  { %v1405_v49 = vand.u32 4294901760, %v478_v39 }
  0xb2   :  { %v1418_v60 = vsub.f32 %v478_v39, %v1405_v49  ;;  %v638_v39 = vand.u32 4294901760, %v637_v32 }
  0xb4   :  { %v630_v8 = vand.u32 4294901760, %v1418_v60 }
  0xb6   :  { %v631_v19 = vsub.f32 %v1418_v60, %v630_v8 }
  0xb7   :  { %414 = vmatmul.f32.vlgmr.msrb.gmra.mxu0 %v165_v11  ;;  %459 = vmatmul.f32.gmra.mxu1 %v173_v15  ;;  %v1342_v11 = vsub.f32 %v484_v2, %v1335_v6  ;;  %v476_v2 = vld [vmem:[#allocation3 + $0x8] sm:$0xff] }
  0xb8   :  { %v1435_v13 = vand.u32 4294901760, %v476_v2 }
  0xb9   :  { %v594_v16 = vand.u32 4294901760, %v1342_v11  ;;  %689 = vmatpush.msra.mxu0 %v1342_v11 }
  0xbb   :  { %v595_v22 = vsub.f32 %v1342_v11, %v594_v16  ;;  %692 = vmatpush.msra.mxu0 %v1357_v17 }
  0xbd   :  { %v596_v27 = vand.u32 4294901760, %v595_v22  ;;  %695 = vmatpush.msra.mxu0 %v1369_v24 }
  0xbf   :  { %418 = vmatmul.f32.gmra.mxu0 %v173_v15  ;;  %463 = vmatmul.f32.gmra.mxu1 %v181_v26  ;;  %v589_v15 = vsub.f32 %v1333_v5, %v588_v10 }
  0xc0   :  { %698 = vmatpush.msra.mxu0 %v1384_v31 }
  0xc1   :  { %v590_v21 = vand.u32 4294901760, %v589_v15  ;;  %v626_v15 = vand.u32 4294901760, %v625_v4 }
  0xc3   :  { %591 = vmatpush.msrb.mxu3 %v590_v21  ;;  %v1441_v21 = vand.u32 4294901760, %v475_v14 }
  0xc5   :  { %597 = vmatpush.msrb.mxu3 %v596_v27  ;;  %v1446_v27 = vsub.f32 %v476_v2, %v1435_v13 }
  0xc7   :  { %422 = vmatmul.f32.gmra.mxu0 %v181_v26  ;;  %467 = vmatmul.f32.gmra.mxu1 %v189_v33  ;;  %v480_v26 = vld [vmem:[#allocation3 + $0x28] sm:$0xff]  ;;  %v642_v34 = vand.u32 4294901760, %v1446_v27 }
  0xc8   :  { %v1379_v30 = vand.u32 4294901760, %v480_v26 }
  0xc9   :  { %v643_v50 = vsub.f32 %v1446_v27, %v642_v34 }
  0xca   :  { %v1391_v35 = vsub.f32 %v480_v26, %v1379_v30  ;;  %759 = vmatpush.msra.mxu1 %v1379_v30  ;;  %512 = vmatpush.msrb.mxu2 %v1379_v30 }
  0xcc   :  { %v618_v42 = vand.u32 4294901760, %v1391_v35  ;;  %701 = vmatpush.msra.mxu0 %v1391_v35  ;;  %761 = vmatpush.msra.mxu1 %v1393_v36 }
  0xcd   :  { %514 = vmatpush.msrb.mxu2 %v1393_v36 }
  0xce   :  { %v619_v55 = vsub.f32 %v1391_v35, %v618_v42  ;;  %704 = vmatpush.msra.mxu0 %v1403_v45  ;;  %763 = vmatpush.msra.mxu1 %v1405_v49 }
  0xcf   :  { %426 = vmatmul.f32.gmra.mxu0 %v189_v33  ;;  %v602_v33 = vand.u32 4294901760, %v601_v28  ;;  %516 = vmatpush.msrb.mxu2 %v1405_v49  ;;  %v632_v28 = vand.u32 4294901760, %v631_v19 }
  0xd0   :  { %v620_v3 = vand.u32 4294901760, %v619_v55  ;;  %707 = vmatpush.msra.mxu0 %v1418_v60  ;;  %765 = vmatpush.msra.mxu1 %v1420_v61  ;;  %v644_v55 = vand.u32 4294901760, %v643_v50 }
  0xd1   :  { %603 = vmatpush.msrb.mxu3 %v602_v33  ;;  %518 = vmatpush.msrb.mxu2 %v1420_v61  ;;  %v1453_v33 = vsub.f32 %v475_v14, %v1441_v21 }
  0xd2   :  { %710 = vmatpush.msra.mxu0 %v1430_v9  ;;  %767 = vmatpush.msra.mxu1 %v1435_v13 }
  0xd3   :  { %609 = vmatpush.msrb.mxu3 %v608_v40  ;;  %520 = vmatpush.msrb.mxu2 %v1435_v13  ;;  %v648_v40 = vand.u32 4294901760, %v1453_v33 }
  0xd4   :  { %713 = vmatpush.msra.mxu0 %v1446_v27  ;;  %769 = vmatpush.msra.mxu1 %v1441_v21 }
  0xd5   :  { %615 = vmatpush.msrb.mxu3 %v614_v62  ;;  %522 = vmatpush.msrb.mxu2 %v1441_v21  ;;  %v649_v54 = vsub.f32 %v1453_v33, %v648_v40 }
  0xd6   :  { %716 = vmatpush.msra.mxu0 %v1453_v33 }
  0xd7   :  { %621 = vmatpush.msrb.mxu3 %v620_v3  ;;  %798 = vmatpush.msra.mxu2 %v558_v46  ;;  %v650_v62 = vand.u32 4294901760, %v649_v54 }
  0xd9   :  { %627 = vmatpush.msrb.mxu3 %v626_v15  ;;  %802 = vmatpush.msra.mxu2 %v564_v51 }
  0xdb   :  { %633 = vmatpush.msrb.mxu3 %v632_v28  ;;  %806 = vmatpush.msra.mxu2 %v570_v57 }
  0xdd   :  { %639 = vmatpush.msrb.mxu3 %v638_v39  ;;  %810 = vmatpush.msra.mxu2 %v576_v63 }
  0xdf   :  { %645 = vmatpush.msrb.mxu3 %v644_v55  ;;  %814 = vmatpush.msra.mxu2 %v582_v7 }
  0xe1   :  { %651 = vmatpush.msrb.mxu3 %v650_v62  ;;  %818 = vmatpush.msra.mxu2 %v588_v10 }
  0xe3   :  { %877 = vmatpush.msra.mxu3 %v1275_v41  ;;  %822 = vmatpush.msra.mxu2 %v594_v16 }
  0xe5   :  { %879 = vmatpush.msra.mxu3 %v1280_v44  ;;  %826 = vmatpush.msra.mxu2 %v600_v23 }
  0xe7   :  { %881 = vmatpush.msra.mxu3 %v1289_v48  ;;  %830 = vmatpush.msra.mxu2 %v606_v29 }
  0xe9   :  { %883 = vmatpush.msra.mxu3 %v1301_v53  ;;  %834 = vmatpush.msra.mxu2 %v612_v38 }
  0xeb   :  { %885 = vmatpush.msra.mxu3 %v1314_v59  ;;  %838 = vmatpush.msra.mxu2 %v618_v42 }
  0xed   :  { %887 = vmatpush.msra.mxu3 %v1322_v0  ;;  %842 = vmatpush.msra.mxu2 %v624_v56 }
  0xef   :  { %889 = vmatpush.msra.mxu3 %v1335_v6  ;;  %846 = vmatpush.msra.mxu2 %v630_v8 }
  0xf1   :  { %891 = vmatpush.msra.mxu3 %v1344_v12  ;;  %850 = vmatpush.msra.mxu2 %v636_v20 }
  0xf3   :  { %893 = vmatpush.msra.mxu3 %v1359_v18  ;;  %854 = vmatpush.msra.mxu2 %v642_v34 }
  0xf5   :  { %895 = vmatpush.msra.mxu3 %v1373_v25  ;;  %858 = vmatpush.msra.mxu2 %v648_v40 }
  0xf7   :  { %897 = vmatpush.msra.mxu3 %v1379_v30 }
  0xf9   :  { %899 = vmatpush.msra.mxu3 %v1393_v36 }
  0xfb   :  { %901 = vmatpush.msra.mxu3 %v1405_v49 }
  0xfd   :  { %903 = vmatpush.msra.mxu3 %v1420_v61 }
  0xff   :  { %905 = vmatpush.msra.mxu3 %v1435_v13 }
 0x101   :  { %907 = vmatpush.msra.mxu3 %v1441_v21 }
 0x10c   :  { %v1397_v37 = vpop.f32.mrf.mxu1 }
 0x114   :  { %v171_v22 = vpop.f32.mrf.mxu0  ;;  %v260_v26 = vpop.f32.mrf.mxu1 }
 0x115   :  { %v306_v44 = vpop.f32.mrf.mxu2  ;;  %v257_v46 = vadd.f32 %v1397_v37, %v171_v22 }
 0x116   :  { %v352_v47 = vpop.f32.mrf.mxu3 }
 0x117   :  { %v307_v51 = vadd.f32 %v306_v44, %v257_v46 }
 0x119   :  { %v353_v57 = vadd.f32 %v352_v47, %v307_v51 }
 0x11c   :  { %v179_v2 = vpop.f32.mrf.mxu0  ;;  %v264_v3 = vpop.f32.mrf.mxu1 }
 0x11d   :  { %v311_v53 = vpop.f32.mrf.mxu2  ;;  %v261_v58 = vadd.f32 %v260_v26, %v179_v2 }
 0x11e   :  { %v358_v0 = vpop.f32.mrf.mxu3 }
 0x11f   :  { %v312_v1 = vadd.f32 %v311_v53, %v261_v58 }
 0x121   :  { %v359_v10 = vadd.f32 %v358_v0, %v312_v1 }
 0x124   :  { %v187_v43 = vpop.f32.mrf.mxu0  ;;  %v268_v41 = vpop.f32.mrf.mxu1 }
 0x125   :  { %v265_v11 = vadd.f32 %v264_v3, %v187_v43  ;;  %v316_v16 = vpop.f32.mrf.mxu2 }
 0x126   :  { %v364_v30 = vpop.f32.mrf.mxu3 }
 0x127   :  { %v317_v24 = vadd.f32 %v316_v16, %v265_v11 }
 0x129   :  { %v365_v36 = vadd.f32 %v364_v30, %v317_v24 }
 0x12c   :  { %v195_v48 = vpop.f32.mrf.mxu0  ;;  %v456_v52 = vpop.f32.mrf.mxu1 }
 0x12d   :  { %v269_v37 = vadd.f32 %v268_v41, %v195_v48  ;;  %v321_v61 = vpop.f32.mrf.mxu2 }
 0x12e   :  { %v370_v15 = vpop.f32.mrf.mxu3 }
 0x12f   :  { %v322_v4 = vadd.f32 %v321_v61, %v269_v37 }
 0x131   :  { %v371_v19 = vadd.f32 %v370_v15, %v322_v4 }
 0x134   :  { %v415_v59 = vpop.f32.mrf.mxu0  ;;  %v460_v7 = vpop.f32.mrf.mxu1 }
 0x135   :  { %v416_v63 = vadd.f32 %v415_v59, %v353_v57 }
 0x137   :  { %v457_v5 = vadd.f32 %v456_v52, %v416_v63 }
 0x139   :  { %v471_v6 = vmul.f32 %v457_v5, %v457_v5 }
 0x13b   :  { %v523_v12 = vand.u32 4294901760, %v471_v6 }
 0x13c   :  { %v419_v17 = vpop.f32.mrf.mxu0  ;;  %v464_v45 = vpop.f32.mrf.mxu1 }
 0x13d   :  { %v524_v18 = vsub.f32 %v471_v6, %v523_v12  ;;  %v420_v23 = vadd.f32 %v419_v17, %v359_v10  ;;  %653 = vmatmul.f32.vlgmr.msrb.gmra.mxu3 %v523_v12 }
 0x13f   :  { %v461_v25 = vadd.f32 %v460_v7, %v420_v23  ;;  %719 = vmatmul.f32.vlgmr.msra.gmra.mxu0 %v524_v18  ;;  %v525_v29 = vand.u32 4294901760, %v524_v18 }
 0x141   :  { %v472_v31 = vmul.f32 %v461_v25, %v461_v25  ;;  %773 = vmatmul.f32.vlgmr.msra.gmra.mxu1 %v525_v29  ;;  %v526_v35 = vsub.f32 %v524_v18, %v525_v29 }
 0x143   :  { %v531_v38 = vand.u32 4294901760, %v472_v31  ;;  %v527_v42 = vand.u32 4294901760, %v526_v35 }
 0x144   :  { %v423_v49 = vpop.f32.mrf.mxu0  ;;  %v468_v28 = vpop.f32.mrf.mxu1 }
 0x145   :  { %v424_v56 = vadd.f32 %v423_v49, %v365_v36  ;;  %528 = vmatmul.f32.vlgmr.msrb.gmra.mxu2 %v527_v42  ;;  %657 = vmatmul.f32.gmra.mxu3 %v531_v38  ;;  %v532_v60 = vsub.f32 %v472_v31, %v531_v38 }
 0x147   :  { %v465_v8 = vadd.f32 %v464_v45, %v424_v56  ;;  %724 = vmatmul.f32.gmra.mxu0 %v532_v60  ;;  %v533_v9 = vand.u32 4294901760, %v532_v60 }
 0x149   :  { %v473_v13 = vmul.f32 %v465_v8, %v465_v8  ;;  %779 = vmatmul.f32.gmra.mxu1 %v533_v9  ;;  %v534_v14 = vsub.f32 %v532_v60, %v533_v9 }
 0x14b   :  { %v539_v20 = vand.u32 4294901760, %v473_v13  ;;  %v535_v21 = vand.u32 4294901760, %v534_v14 }
 0x14c   :  { %v427_v22 = vpop.f32.mrf.mxu0 }
 0x14d   :  { %v428_v26 = vadd.f32 %v427_v22, %v371_v19  ;;  %536 = vmatmul.f32.gmra.mxu2 %v535_v21  ;;  %661 = vmatmul.f32.gmra.mxu3 %v539_v20  ;;  %v540_v27 = vsub.f32 %v473_v13, %v539_v20 }
 0x14f   :  { %v469_v32 = vadd.f32 %v468_v28, %v428_v26  ;;  %729 = vmatmul.f32.gmra.mxu0 %v540_v27  ;;  %v541_v33 = vand.u32 4294901760, %v540_v27 }
 0x151   :  { %v474_v34 = vmul.f32 %v469_v32, %v469_v32  ;;  %785 = vmatmul.f32.gmra.mxu1 %v541_v33  ;;  %v542_v39 = vsub.f32 %v540_v27, %v541_v33 }
 0x153   :  { %v547_v40 = vand.u32 4294901760, %v474_v34  ;;  %v543_v50 = vand.u32 4294901760, %v542_v39 }
 0x155   :  { %544 = vmatmul.f32.gmra.mxu2 %v543_v50  ;;  %665 = vmatmul.f32.gmra.mxu3 %v547_v40  ;;  %v548_v54 = vsub.f32 %v474_v34, %v547_v40 }
 0x157   :  { %734 = vmatmul.f32.gmra.mxu0 %v548_v54  ;;  %v549_v55 = vand.u32 4294901760, %v548_v54 }
 0x159   :  { %791 = vmatmul.f32.gmra.mxu1 %v549_v55  ;;  %v550_v62 = vsub.f32 %v548_v54, %v549_v55 }
 0x15b   :  { %v551_v2 = vand.u32 4294901760, %v550_v62 }
 0x15d   :  { %552 = vmatmul.f32.gmra.mxu2 %v551_v2  ;;  %909 = vmatmul.f32.vlgmr.msra.gmra.mxu3 %v523_v12 }
 0x165   :  { %860 = vmatmul.f32.vlgmr.msra.gmra.mxu2 %v523_v12  ;;  %913 = vmatmul.f32.gmra.mxu3 %v531_v38 }
 0x16d   :  { %864 = vmatmul.f32.gmra.mxu2 %v531_v38  ;;  %917 = vmatmul.f32.gmra.mxu3 %v539_v20 }
 0x175   :  { %868 = vmatmul.f32.gmra.mxu2 %v539_v20  ;;  %921 = vmatmul.f32.gmra.mxu3 %v547_v40 }
 0x17d   :  { %872 = vmatmul.f32.gmra.mxu2 %v547_v40 }
 0x1bc   :  { %v720_v51 = vpop.f32.mrf.mxu0 }
 0x1be   :  { %v774_v53 = vpop.f32.mrf.mxu1 }
 0x1c0   :  { %v654_v3 = vpop.f32.mrf.mxu3 }
 0x1c4   :  { %v725_v63 = vpop.f32.mrf.mxu0 }
 0x1c6   :  { %v780_v7 = vpop.f32.mrf.mxu1 }
 0x1c8   :  { %v529_v43 = vpop.f32.mrf.mxu2  ;;  %v658_v41 = vpop.f32.mrf.mxu3 }
 0x1c9   :  { %v655_v52 = vadd.f32 %v654_v3, %v529_v43 }
 0x1cb   :  { %v721_v58 = vadd.f32 %v720_v51, %v655_v52 }
 0x1cc   :  { %v730_v18 = vpop.f32.mrf.mxu0 }
 0x1cd   :  { %v775_v1 = vadd.f32 %v774_v53, %v721_v58 }
 0x1ce   :  { %v786_v31 = vpop.f32.mrf.mxu1 }
 0x1d0   :  { %v537_v44 = vpop.f32.mrf.mxu2  ;;  %v662_v46 = vpop.f32.mrf.mxu3 }
 0x1d1   :  { %v659_v0 = vadd.f32 %v658_v41, %v537_v44 }
 0x1d3   :  { %v726_v10 = vadd.f32 %v725_v63, %v659_v0 }
 0x1d4   :  { %v735_v60 = vpop.f32.mrf.mxu0 }
 0x1d5   :  { %v781_v17 = vadd.f32 %v780_v7, %v726_v10 }
 0x1d6   :  { %v792_v14 = vpop.f32.mrf.mxu1 }
 0x1d8   :  { %v545_v47 = vpop.f32.mrf.mxu2  ;;  %v666_v48 = vpop.f32.mrf.mxu3 }
 0x1d9   :  { %v663_v16 = vadd.f32 %v662_v46, %v545_v47 }
 0x1db   :  { %v731_v29 = vadd.f32 %v730_v18, %v663_v16 }
 0x1dd   :  { %v787_v38 = vadd.f32 %v786_v31, %v731_v29 }
 0x1e0   :  { %v553_v57 = vpop.f32.mrf.mxu2  ;;  %v910_v59 = vpop.f32.mrf.mxu3 }
 0x1e1   :  { %v667_v37 = vadd.f32 %v666_v48, %v553_v57 }
 0x1e3   :  { %v736_v4 = vadd.f32 %v735_v60, %v667_v37 }
 0x1e5   :  { %v793_v19 = vadd.f32 %v792_v14, %v736_v4 }
 0x1e8   :  { %v861_v5 = vpop.f32.mrf.mxu2  ;;  %v914_v12 = vpop.f32.mrf.mxu3 }
 0x1e9   :  { %v862_v6 = vadd.f32 %v861_v5, %v775_v1 }
 0x1eb   :  { %v911_v11 = vadd.f32 %v910_v59, %v862_v6 }
 0x1ed   :  { %1030 = vlog2.f32 %v911_v11 }
 0x1f0   :  { %v865_v23 = vpop.f32.mrf.mxu2  ;;  %v918_v42 = vpop.f32.mrf.mxu3 }
 0x1f1   :  { %v866_v24 = vadd.f32 %v865_v23, %v781_v17 }
 0x1f3   :  { %v1031_v25 = vpop.eup %1030  ;;  %v915_v30 = vadd.f32 %v914_v12, %v866_v24 }
 0x1f4   :  { %v926_v35 = vmul.f32 0.6931472, %v1031_v25 }
 0x1f5   :  { %1032 = vlog2.f32 %v915_v30 }
 0x1f6   :  { %v933_v36 = vmul.f32 0.4342945, %v926_v35 }
 0x1f8   :  { %v869_v45 = vpop.f32.mrf.mxu2  ;;  %v937_v49 = vand.u32 2147483647, %v933_v36  ;;  %v922_v26 = vpop.f32.mrf.mxu3 }
 0x1f9   :  { %v870_v56 = vadd.f32 %v869_v45, %v787_v38 }
 0x1fa   :  { %vm941_vm5 = vcmp.eq.f32.partialorder %v937_v49, inf }
 0x1fb   :  { %v1033_v61 = vpop.eup %1032  ;;  %v919_v8 = vadd.f32 %v918_v42, %v870_v56  ;;  %v945_v9 = vsel %vm941_vm5, 0.0, %v933_v36 }
 0x1fc   :  { %949 = vxpose.xlu0.b32.start [1/4] (short) (narrow) %v945_v9, 16  ;;  %v928_v13 = vmul.f32 0.6931472, %v1033_v61 }
 0x1fd   :  { %1034 = vlog2.f32 %v919_v8 }
 0x1fe   :  { %v934_v15 = vmul.f32 0.4342945, %v928_v13 }
 0x200   :  { %v873_v20 = vpop.f32.mrf.mxu2  ;;  %v938_v21 = vand.u32 2147483647, %v934_v15 }
 0x201   :  { %v874_v22 = vadd.f32 %v873_v20, %v793_v19 }
 0x202   :  { %vm942_vm6 = vcmp.eq.f32.partialorder %v938_v21, inf }
 0x203   :  { %v1035_v27 = vpop.eup %1034  ;;  %v923_v28 = vadd.f32 %v922_v26, %v874_v22  ;;  %v946_v32 = vsel %vm942_vm6, 0.0, %v934_v15 }
 0x204   :  { %950 = vxpose.xlu0.b32.cont [2/4] (short) (narrow) %v946_v32, 16  ;;  %v930_v33 = vmul.f32 0.6931472, %v1035_v27 }
 0x205   :  { %1036 = vlog2.f32 %v923_v28 }
 0x206   :  { %v935_v34 = vmul.f32 0.4342945, %v930_v33 }
 0x208   :  { %v939_v39 = vand.u32 2147483647, %v935_v34 }
 0x20a   :  { %vm943_vm7 = vcmp.eq.f32.partialorder %v939_v39, inf }
 0x20b   :  { %v1037_v40 = vpop.eup %1036  ;;  %v947_v50 = vsel %vm943_vm7, 0.0, %v935_v34 }
 0x20c   :  { %951 = vxpose.xlu0.b32.cont [3/4] (short) (narrow) %v947_v50, 16  ;;  %v932_v54 = vmul.f32 0.6931472, %v1037_v40 }
 0x20e   :  { %v936_v55 = vmul.f32 0.4342945, %v932_v54 }
 0x210   :  { %v940_v62 = vand.u32 2147483647, %v936_v55 }
 0x212   :  { %vm944_vm8 = vcmp.eq.f32.partialorder %v940_v62, inf }
 0x213   :  { %v948_v2 = vsel %vm944_vm8, 0.0, %v936_v55 }
 0x214   :  { %952 = vxpose.xlu0.b32.end [4/4] (short) (narrow) %v948_v2, 16 }
 0x2a0   :  { %v965_v3 = vpop.trf.xlu0 }
 0x2a1   :  { %981 = vst.msk [vmem:[#allocation6] sm:$0xff] %vm33_vm0, %v965_v3  ;;  %985 = vrot.lane.b32.xlu1 %v965_v3, %s1096_s0 }
 0x2a8   :  { %v966_v43 = vpop.trf.xlu0 }
 0x2a9   :  { %982 = vst.msk [vmem:[#allocation6 + $0x8] sm:$0xff] %vm33_vm0, %v966_v43  ;;  %987 = vrot.lane.b32.xlu2 %v966_v43, %s1096_s0 }
 0x303   :  { %v988_v41 = vpop.permute.xlu2 %987 }
 0x304   :  { %993 = vst.msk [vmem:[#allocation6 + $0x18] sm:$0xff] %vm33_vm0, %v988_v41 }
 0x313   :  { %v986_v44 = vpop.permute.xlu1 %985 }
 0x314   :  { %992 = vst.msk [vmem:[#allocation6 + $0x10] sm:$0xff] %vm33_vm0, %v986_v44 }
 0x315   :  { %1006 = dma.vmem_to_hbm [thread:$0]  %s999_s16, 512, %s1001_s21, [#allocation5], %s1091_s17, %s1091_s17, %s1092_s18  }
 0x316   :  { %1088 = dma.done.wait [#allocation5], 512  }
 0x317   :  { %1089 = vsyncadd [#allocation5], 4294966784 }
 0x318   :  { %1011 = vsyncpa [#allocation4], 1 }
 0x319   :  { %1012 = vsyncpa [#allocation5], 1 }

</bundles_post_ra>
